<compile_context>
chip_gen: v7x
topology: tpu7x:2x2x1
jax: 0.10.0
libtpu: 0.0.40
codegen_flags: <defaults>
</compile_context>

<pallas_src>
import functools

import jax
import jax.numpy as jnp
from jax import lax
from jax.experimental import pallas as pl
from jax.experimental.pallas import tpu as pltpu

KERNEL_SIZE = 5
PADDING = 2
BN_EPS = 1e-5
NEG_SLOPE = 0.1

_HALO = PADDING                       # 2 columns on each side
_VMEM_LIMIT = 32 * 1024 * 1024        # scoped-VMEM request: safe on v5e / v6e / v7x
_TILE_BUDGET = 10 * 1024 * 1024       # per-tile VMEM working-set budget (incl. double buffers)


def _pick_tile(length, bytes_per_col, candidates=(4096, 2048, 1024, 512, 256, 128)):
    """Largest L-tile that (a) is a 128-multiple dividing L and (b) fits the VMEM budget.
    Falls back to the full (ragged) length when L is not a multiple of 128."""
    if length % 128 != 0:
        return length
    for t in candidates:
        if t <= length and length % t == 0 and t * bytes_per_col <= _TILE_BUDGET:
            return t
    return 128


# --------------------------------------------------------------------------------------
# Phase 1: Conv1d (k=5, s=1, p=2) + bias, and per-tile BN partial sums (sum, sum of sq).
# --------------------------------------------------------------------------------------
def conv_stats_kernel(x_ref, xl_ref, xr_ref, w_ref, b_ref, out_ref, stats_ref, *, halo_w):
    # x_ref:     (1, C_in, T)        current L-tile of x
    # xl_ref:    (1, C_in, halo_w)   block ending exactly where this tile starts (left halo)
    # xr_ref:    (1, C_in, halo_w)   block starting exactly where this tile ends (right halo)
    # w_ref:     (C_out, K*C_in)     bf16 im2col-flattened conv weight
    # b_ref:     (C_out, 1)          conv bias (f32)
    # out_ref:   (1, C_out, T)       conv output tile (f32)
    # stats_ref: (1, C_out, 2)       per-tile [sum, sum_sq] per channel (f32)
    l = pl.program_id(1)
    n_l = pl.num_programs(1)

    # Cast to bf16 up front: halves the im2col working set / copy traffic in VMEM.
    xc = x_ref[0].astype(jnp.bfloat16)                                    # (C_in, T)
    left2 = xl_ref[0, :, halo_w - _HALO:halo_w].astype(jnp.bfloat16)      # (C_in, 2)
    right2 = xr_ref[0, :, 0:_HALO].astype(jnp.bfloat16)                   # (C_in, 2)
    # Zero the halo at the sequence boundaries (this *is* the conv's zero padding).
    left2 = jnp.where(l > 0, left2, jnp.zeros_like(left2))
    right2 = jnp.where(l < n_l - 1, right2, jnp.zeros_like(right2))

    window = jnp.concatenate([left2, xc, right2], axis=-1)                # (C_in, T + 4)
    t_len = xc.shape[-1]

    # im2col: row block k holds x shifted by tap k -> one deep, lane-dense MXU matmul.
    xcol = jnp.concatenate(
        [window[:, k:k + t_len] for k in range(KERNEL_SIZE)], axis=0)     # (K*C_in, T)

    conv = jnp.dot(w_ref[...], xcol, preferred_element_type=jnp.float32)  # (C_out, T) f32
    conv = conv + b_ref[...]                                              # broadcast (C_out, 1)

    out_ref[0] = conv
    # One-pass BN partials (cross-lane reductions go to the XLU slot).
    stats_ref[0, :, 0:1] = jnp.sum(conv, axis=-1, keepdims=True)
    stats_ref[0, :, 1:2] = jnp.sum(conv * conv, axis=-1, keepdims=True)


# --------------------------------------------------------------------------------------
# Phase 2: y = conv * scale + shift  (folded BatchNorm affine)  ->  LeakyReLU(0.1)
# --------------------------------------------------------------------------------------
def bn_lrelu_kernel(y_ref, scale_ref, shift_ref, o_ref):
    y = y_ref[0] * scale_ref[...] + shift_ref[...]
    o_ref[0] = jnp.where(y >= 0, y, NEG_SLOPE * y)


@jax.jit
def upsampling_layer(x, weight, bias, gamma, beta):
    """x: (N, C_in, L) f32; weight: (C_out, C_in, K); bias/gamma/beta: (C_out,)."""
    n, c_in, length = x.shape
    c_out, _, k = weight.shape

    # ---- Tile sizing (per-column VMEM bytes, incl. double-buffering + in-kernel temps) ----
    per_col_conv = 2 * (4 * c_in + 2 * k * c_in + 4 * c_out)   # x f32 + im2col bf16 + out f32
    t1 = _pick_tile(length, per_col_conv)
    n_l1 = length // t1
    halo_w = 128 if t1 % 128 == 0 else length   # halo block width (128-multiple or full L)

    xf = x.astype(jnp.float32)
    # im2col-flattened weight: w_flat[o, k*C_in + i] = weight[o, i, k]; bf16 for the MXU.
    w_flat = jnp.transpose(weight, (0, 2, 1)).reshape(c_out, k * c_in).astype(jnp.bfloat16)
    b2 = bias.reshape(c_out, 1).astype(jnp.float32)

    if halo_w == 128:
        tpb = t1 // 128                        # 128-wide blocks per tile
        last_blk = length // 128 - 1
        left_map = lambda b, l: (b, 0, jnp.maximum(l * tpb - 1, 0))
        right_map = lambda b, l: (b, 0, jnp.minimum((l + 1) * tpb, last_blk))
    else:                                      # single full-length tile (small / ragged L)
        left_map = lambda b, l: (b, 0, 0)
        right_map = lambda b, l: (b, 0, 0)

    cparams = pltpu.CompilerParams(
        dimension_semantics=("parallel", "parallel"),
        vmem_limit_bytes=_VMEM_LIMIT)

    # ---- Phase 1: conv + per-tile BN partials ----
    conv_out, partial = pl.pallas_call(
        functools.partial(conv_stats_kernel, halo_w=halo_w),
        grid=(n, n_l1),
        in_specs=[
            pl.BlockSpec((1, c_in, t1), lambda b, l: (b, 0, l)),        # current tile
            pl.BlockSpec((1, c_in, halo_w), left_map),                  # left halo block
            pl.BlockSpec((1, c_in, halo_w), right_map),                 # right halo block
            pl.BlockSpec((c_out, k * c_in), lambda b, l: (0, 0)),       # flattened weight
            pl.BlockSpec((c_out, 1), lambda b, l: (0, 0)),              # bias
        ],
        out_specs=[
            pl.BlockSpec((1, c_out, t1), lambda b, l: (b, 0, l)),
            pl.BlockSpec((1, c_out, 2), lambda b, l: (b * n_l1 + l, 0, 0)),
        ],
        out_shape=[
            jax.ShapeDtypeStruct((n, c_out, length), jnp.float32),
            jax.ShapeDtypeStruct((n * n_l1, c_out, 2), jnp.float32),
        ],
        compiler_params=cparams,
    )(xf, xf, xf, w_flat, b2)

    # ---- Tiny JAX glue: global (N, L) batch statistics + folded BN affine ----
    totals = jnp.sum(partial, axis=0)                          # (C_out, 2)
    cnt = float(n * length)
    mean = totals[:, 0] / cnt
    var = jnp.maximum(totals[:, 1] / cnt - mean * mean, 0.0)   # biased variance (training mode)
    scale = gamma * lax.rsqrt(var + BN_EPS)
    shift = beta - mean * scale

    # ---- Phase 2: normalize + LeakyReLU (fully parallel elementwise sweep) ----
    per_col_bn = 2 * (4 * c_out + 4 * c_out)                   # in f32 + out f32, double-buffered
    t2 = _pick_tile(length, per_col_bn,
                    candidates=(8192, 4096, 2048, 1024, 512, 256, 128))
    n_l2 = length // t2

    out = pl.pallas_call(
        bn_lrelu_kernel,
        grid=(n, n_l2),
        in_specs=[
            pl.BlockSpec((1, c_out, t2), lambda b, l: (b, 0, l)),
            pl.BlockSpec((c_out, 1), lambda b, l: (0, 0)),
            pl.BlockSpec((c_out, 1), lambda b, l: (0, 0)),
        ],
        out_specs=pl.BlockSpec((1, c_out, t2), lambda b, l: (b, 0, l)),
        out_shape=jax.ShapeDtypeStruct((n, c_out, length), jnp.float32),
        input_output_aliases={0: 0},     # reuse the conv intermediate buffer for the output
        compiler_params=cparams,
    )(conv_out, scale.reshape(c_out, 1), shift.reshape(c_out, 1))
    return out


def reference(x, weight, bias, gamma, beta, conv_dtype=jnp.float32):
    """Pure-JAX reference. conv_dtype=bf16 mirrors the kernel's MXU precision policy."""
    out = lax.conv_general_dilated(
        x.astype(conv_dtype), weight.astype(conv_dtype), window_strides=(1,),
        padding=[(PADDING, PADDING)], dimension_numbers=('NCH', 'OIH', 'NCH'),
        preferred_element_type=jnp.float32)
    out = out + bias[None, :, None]
    mean = jnp.mean(out, axis=(0, 2), keepdims=True)
    var = jnp.mean((out - mean) ** 2, axis=(0, 2), keepdims=True)
    y = (out - mean) * lax.rsqrt(var + BN_EPS)
    y = y * gamma[None, :, None] + beta[None, :, None]
    return jnp.where(y >= 0, y, NEG_SLOPE * y)


def _make_params(key, c_in, c_out):
    kw, kb = jax.random.split(key)
    fan_in = c_in * KERNEL_SIZE
    bound = 1.0 / (fan_in ** 0.5)
    weight = jax.random.uniform(kw, (c_out, c_in, KERNEL_SIZE),
                                minval=-bound, maxval=bound, dtype=jnp.float32)
    bias = jax.random.uniform(kb, (c_out,), minval=-bound, maxval=bound, dtype=jnp.float32)
    gamma = jnp.ones((c_out,), jnp.float32)   # BN weight init
    beta = jnp.zeros((c_out,), jnp.float32)   # BN bias init
    return weight, bias, gamma, beta


def _check(x, weight, bias, gamma, beta):
    out = jax.block_until_ready(upsampling_layer(x, weight, bias, gamma, beta))
    assert out.shape == (x.shape[0], weight.shape[0], x.shape[2])
    # Tight check against a reference using the same bf16-operand / f32-accumulate conv.
    ref_bf16 = reference(x, weight, bias, gamma, beta, conv_dtype=jnp.bfloat16)
    assert jnp.allclose(out, ref_bf16, atol=1e-4, rtol=1e-4), "mismatch vs bf16-conv reference"
    # Looser check against the full-f32 reference (bf16 MXU cast is the only deviation).
    ref_f32 = reference(x, weight, bias, gamma, beta, conv_dtype=jnp.float32)
    assert jnp.allclose(out, ref_f32, atol=2e-2, rtol=2e-2), "mismatch vs f32 reference"
    return out


if __name__ == "__main__":
    key = jax.random.PRNGKey(0)
    k0, k1, k2, k3 = jax.random.split(key, 4)

    # Small shapes consistent with the module: batch=2, channel_in=4, channel_out=8, length=16.
    N, C_IN, C_OUT, L = 2, 4, 8, 16
    x_small = jax.random.normal(k0, (N, C_IN, L), dtype=jnp.float32)
    params_small = _make_params(k1, C_IN, C_OUT)
    _check(x_small, *params_small)

    # Second check exercising the tiled (128-halo, multi-tile) path: L = 8192 -> 2 conv tiles.
    L2 = 8192
    x_big = jax.random.normal(k2, (N, C_IN, L2), dtype=jnp.float32)
    params_big = _make_params(k3, C_IN, C_OUT)
    _check(x_big, *params_big)

    # TODO(synk): BatchNorm1d running_mean / running_var buffer updates (training-state side
    # effect) are not produced; they do not affect the forward output.
    print("KERNEL_OK")
</pallas_src>

<mosaic_0001>
module attributes {stable_mosaic.version = 11 : i64} {
  func.func @bn_lrelu_kernel(%arg0: i32, %arg1: i32, %arg2: memref<1x8x16xf32, #tpu.memory_space<vmem>>, %arg3: memref<8x1xf32, #tpu.memory_space<vmem>>, %arg4: memref<8x1xf32, #tpu.memory_space<vmem>>, %arg5: memref<1x8x16xf32, #tpu.memory_space<vmem>>) attributes {dimension_semantics = [#tpu.dimension_semantics<parallel>, #tpu.dimension_semantics<parallel>], iteration_bounds = array<i64: 2, 1>, scalar_prefetch = 0 : i64, scratch_operands = 0 : i64, tpu.core_type = #tpu.core_type<tc>, window_params = [{transform_indices = @transform_0, window_bounds = array<i64: 1, 8, 16>}, {pipeline_mode = #tpu.pipeline_mode<synchronous>, transform_indices = @transform_1, window_bounds = array<i64: 8, 1>}, {pipeline_mode = #tpu.pipeline_mode<synchronous>, transform_indices = @transform_2, window_bounds = array<i64: 8, 1>}, {transform_indices = @transform_3, window_bounds = array<i64: 1, 8, 16>}]} {
    %c0 = arith.constant 0 : index
    %c0_0 = arith.constant 0 : index
    %c0_1 = arith.constant 0 : index
    %0 = vector.load %arg2[%c0, %c0_0, %c0_1] : memref<1x8x16xf32, #tpu.memory_space<vmem>>, vector<1x8x16xf32>
    %1 = vector.shape_cast %0 : vector<1x8x16xf32> to vector<8x16xf32>
    %c0_2 = arith.constant 0 : index
    %c0_3 = arith.constant 0 : index
    %2 = vector.load %arg3[%c0_2, %c0_3] : memref<8x1xf32, #tpu.memory_space<vmem>>, vector<8x1xf32>
    %3 = vector.broadcast %2 : vector<8x1xf32> to vector<8x16xf32>
    %4 = arith.mulf %1, %3 : vector<8x16xf32>
    %c0_4 = arith.constant 0 : index
    %c0_5 = arith.constant 0 : index
    %5 = vector.load %arg4[%c0_4, %c0_5] : memref<8x1xf32, #tpu.memory_space<vmem>>, vector<8x1xf32>
    %6 = vector.broadcast %5 : vector<8x1xf32> to vector<8x16xf32>
    %7 = arith.addf %4, %6 : vector<8x16xf32>
    %cst = arith.constant 0.000000e+00 : f32
    %8 = vector.broadcast %cst : f32 to vector<8x16xf32>
    %9 = arith.cmpf oge, %7, %8 : vector<8x16xf32>
    %cst_6 = arith.constant 1.000000e-01 : f32
    %10 = vector.broadcast %cst_6 : f32 to vector<8x16xf32>
    %11 = arith.mulf %10, %7 : vector<8x16xf32>
    %12 = arith.select %9, %7, %11 : vector<8x16xi1>, vector<8x16xf32>
    %c0_7 = arith.constant 0 : index
    %c0_8 = arith.constant 0 : index
    %c0_9 = arith.constant 0 : index
    %13 = vector.load %arg5[%c0_7, %c0_8, %c0_9] : memref<1x8x16xf32, #tpu.memory_space<vmem>>, vector<1x8x16xf32>
    %14 = vector.shape_cast %13 : vector<1x8x16xf32> to vector<8x16xf32>
    %15 = vector.shape_cast %12 : vector<8x16xf32> to vector<1x8x16xf32>
    tpu.vector_store %arg5[%c0_7, %c0_8, %c0_9], %15 {strides = array<i32>} : memref<1x8x16xf32, #tpu.memory_space<vmem>>, vector<1x8x16xf32>,
    return
  }
  func.func @transform_0(%arg0: i32, %arg1: i32) -> (i32, i32, i32) {
    %c0_i32 = arith.constant 0 : i32
    %c0_i32_0 = arith.constant 0 : i32
    return %arg0, %c0_i32, %arg1 : i32, i32, i32
  }
  func.func @transform_1(%arg0: i32, %arg1: i32) -> (i32, i32) {
    %c0_i32 = arith.constant 0 : i32
    %c0_i32_0 = arith.constant 0 : i32
    %c0_i32_1 = arith.constant 0 : i32
    return %c0_i32, %c0_i32_0 : i32, i32
  }
  func.func @transform_2(%arg0: i32, %arg1: i32) -> (i32, i32) {
    %c0_i32 = arith.constant 0 : i32
    %c0_i32_0 = arith.constant 0 : i32
    %c0_i32_1 = arith.constant 0 : i32
    return %c0_i32, %c0_i32_0 : i32, i32
  }
  func.func @transform_3(%arg0: i32, %arg1: i32) -> (i32, i32, i32) {
    %c0_i32 = arith.constant 0 : i32
    %c0_i32_0 = arith.constant 0 : i32
    return %arg0, %c0_i32, %arg1 : i32, i32, i32
  }
}

module attributes {stable_mosaic.version = 11 : i64} {
  func.func @conv_stats_kernel(%arg0: i32, %arg1: i32, %arg2: memref<1x4x16xf32, #tpu.memory_space<vmem>>, %arg3: memref<1x4x16xf32, #tpu.memory_space<vmem>>, %arg4: memref<1x4x16xf32, #tpu.memory_space<vmem>>, %arg5: memref<8x20xbf16, #tpu.memory_space<vmem>>, %arg6: memref<8x1xf32, #tpu.memory_space<vmem>>, %arg7: memref<1x8x16xf32, #tpu.memory_space<vmem>>, %arg8: memref<1x8x2xf32, #tpu.memory_space<vmem>>) attributes {dimension_semantics = [#tpu.dimension_semantics<parallel>, #tpu.dimension_semantics<parallel>], iteration_bounds = array<i64: 2, 1>, scalar_prefetch = 0 : i64, scratch_operands = 0 : i64, tpu.core_type = #tpu.core_type<tc>, window_params = [{transform_indices = @transform_0, window_bounds = array<i64: 1, 4, 16>}, {transform_indices = @transform_1, window_bounds = array<i64: 1, 4, 16>}, {transform_indices = @transform_2, window_bounds = array<i64: 1, 4, 16>}, {pipeline_mode = #tpu.pipeline_mode<synchronous>, transform_indices = @transform_3, window_bounds = array<i64: 8, 20>}, {pipeline_mode = #tpu.pipeline_mode<synchronous>, transform_indices = @transform_4, window_bounds = array<i64: 8, 1>}, {transform_indices = @transform_5, window_bounds = array<i64: 1, 8, 16>}, {transform_indices = @transform_6, window_bounds = array<i64: 1, 8, 2>}]} {
    %c0 = arith.constant 0 : index
    %c0_0 = arith.constant 0 : index
    %c0_1 = arith.constant 0 : index
    %0 = vector.load %arg2[%c0, %c0_0, %c0_1] : memref<1x4x16xf32, #tpu.memory_space<vmem>>, vector<1x4x16xf32>
    %1 = vector.shape_cast %0 : vector<1x4x16xf32> to vector<4x16xf32>
    %2 = arith.truncf %1 : vector<4x16xf32> to vector<4x16xbf16>
    %c0_2 = arith.constant 0 : index
    %c0_3 = arith.constant 0 : index
    %c14 = arith.constant 14 : index
    %3 = vector.load %arg3[%c0_2, %c0_3, %c14] : memref<1x4x16xf32, #tpu.memory_space<vmem>>, vector<1x4x2xf32>
    %4 = vector.shape_cast %3 : vector<1x4x2xf32> to vector<4x2xf32>
    %5 = arith.truncf %4 : vector<4x2xf32> to vector<4x2xbf16>
    %c0_4 = arith.constant 0 : index
    %c0_5 = arith.constant 0 : index
    %c0_6 = arith.constant 0 : index
    %6 = vector.load %arg4[%c0_4, %c0_5, %c0_6] : memref<1x4x16xf32, #tpu.memory_space<vmem>>, vector<1x4x2xf32>
    %7 = vector.shape_cast %6 : vector<1x4x2xf32> to vector<4x2xf32>
    %8 = arith.truncf %7 : vector<4x2xf32> to vector<4x2xbf16>
    %c0_i32 = arith.constant 0 : i32
    %9 = arith.cmpi sgt, %arg1, %c0_i32 : i32
    %cst = arith.constant 0.000000e+00 : bf16
    %10 = vector.broadcast %cst : bf16 to vector<4x2xbf16>
    %11 = arith.select %9, %5, %10 : vector<4x2xbf16>
    %c0_i32_7 = arith.constant 0 : i32
    %12 = arith.cmpi slt, %arg1, %c0_i32_7 : i32
    %cst_8 = arith.constant 0.000000e+00 : bf16
    %13 = vector.broadcast %cst_8 : bf16 to vector<4x2xbf16>
    %14 = arith.select %12, %8, %13 : vector<4x2xbf16>
    %15 = tpu.concatenate %11, %2, %14 in 1 : vector<4x2xbf16>, vector<4x16xbf16>, vector<4x2xbf16> -> vector<4x20xbf16>
    %16 = vector.extract_strided_slice %15 {offsets = [0, 0], sizes = [4, 16], strides = [1, 1]} : vector<4x20xbf16> to vector<4x16xbf16>
    %17 = vector.extract_strided_slice %15 {offsets = [0, 1], sizes = [4, 16], strides = [1, 1]} : vector<4x20xbf16> to vector<4x16xbf16>
    %18 = vector.extract_strided_slice %15 {offsets = [0, 2], sizes = [4, 16], strides = [1, 1]} : vector<4x20xbf16> to vector<4x16xbf16>
    %19 = vector.extract_strided_slice %15 {offsets = [0, 3], sizes = [4, 16], strides = [1, 1]} : vector<4x20xbf16> to vector<4x16xbf16>
    %20 = vector.extract_strided_slice %15 {offsets = [0, 4], sizes = [4, 16], strides = [1, 1]} : vector<4x20xbf16> to vector<4x16xbf16>
    %21 = tpu.concatenate %16, %17, %18, %19, %20 in 0 : vector<4x16xbf16>, vector<4x16xbf16>, vector<4x16xbf16>, vector<4x16xbf16>, vector<4x16xbf16> -> vector<20x16xbf16>
    %c0_9 = arith.constant 0 : index
    %c0_10 = arith.constant 0 : index
    %22 = vector.load %arg5[%c0_9, %c0_10] : memref<8x20xbf16, #tpu.memory_space<vmem>>, vector<8x20xbf16>
    %cst_11 = arith.constant dense<0.000000e+00> : vector<8x16xf32>
    %23 = tpu.matmul %22, %21, %cst_11 {dimension_numbers = #tpu.dot_dimension_numbers<[1], [0], [0], [1], [0, 0, 1, 1], [], []>} : vector<8x20xbf16>, vector<20x16xbf16>, vector<8x16xf32> -> vector<8x16xf32>
    %c0_12 = arith.constant 0 : index
    %c0_13 = arith.constant 0 : index
    %24 = vector.load %arg6[%c0_12, %c0_13] : memref<8x1xf32, #tpu.memory_space<vmem>>, vector<8x1xf32>
    %25 = vector.broadcast %24 : vector<8x1xf32> to vector<8x16xf32>
    %26 = arith.addf %23, %25 : vector<8x16xf32>
    %c0_14 = arith.constant 0 : index
    %c0_15 = arith.constant 0 : index
    %c0_16 = arith.constant 0 : index
    %27 = vector.load %arg7[%c0_14, %c0_15, %c0_16] : memref<1x8x16xf32, #tpu.memory_space<vmem>>, vector<1x8x16xf32>
    %28 = vector.shape_cast %27 : vector<1x8x16xf32> to vector<8x16xf32>
    %29 = vector.shape_cast %26 : vector<8x16xf32> to vector<1x8x16xf32>
    tpu.vector_store %arg7[%c0_14, %c0_15, %c0_16], %29 {strides = array<i32>} : memref<1x8x16xf32, #tpu.memory_space<vmem>>, vector<1x8x16xf32>,
    %cst_17 = arith.constant dense<0.000000e+00> : vector<8xf32>
    %30 = vector.multi_reduction <add>, %26, %cst_17 [1] : vector<8x16xf32> to vector<8xf32>
    %31 = vector.shape_cast %30 : vector<8xf32> to vector<8x1xf32>
    %c0_18 = arith.constant 0 : index
    %c0_19 = arith.constant 0 : index
    %c0_20 = arith.constant 0 : index
    %32 = vector.load %arg8[%c0_18, %c0_19, %c0_20] : memref<1x8x2xf32, #tpu.memory_space<vmem>>, vector<1x8x1xf32>
    %33 = vector.shape_cast %32 : vector<1x8x1xf32> to vector<8x1xf32>
    %34 = vector.shape_cast %31 : vector<8x1xf32> to vector<1x8x1xf32>
    tpu.vector_store %arg8[%c0_18, %c0_19, %c0_20], %34 {strides = array<i32>} : memref<1x8x2xf32, #tpu.memory_space<vmem>>, vector<1x8x1xf32>,
    %35 = arith.mulf %26, %26 : vector<8x16xf32>
    %cst_21 = arith.constant dense<0.000000e+00> : vector<8xf32>
    %36 = vector.multi_reduction <add>, %35, %cst_21 [1] : vector<8x16xf32> to vector<8xf32>
    %37 = vector.shape_cast %36 : vector<8xf32> to vector<8x1xf32>
    %c0_22 = arith.constant 0 : index
    %c0_23 = arith.constant 0 : index
    %c1 = arith.constant 1 : index
    %38 = vector.load %arg8[%c0_22, %c0_23, %c1] : memref<1x8x2xf32, #tpu.memory_space<vmem>>, vector<1x8x1xf32>
    %39 = vector.shape_cast %38 : vector<1x8x1xf32> to vector<8x1xf32>
    %40 = vector.shape_cast %37 : vector<8x1xf32> to vector<1x8x1xf32>
    tpu.vector_store %arg8[%c0_22, %c0_23, %c1], %40 {strides = array<i32>} : memref<1x8x2xf32, #tpu.memory_space<vmem>>, vector<1x8x1xf32>,
    return
  }
  func.func @transform_0(%arg0: i32, %arg1: i32) -> (i32, i32, i32) {
    %c0_i32 = arith.constant 0 : i32
    %c0_i32_0 = arith.constant 0 : i32
    return %arg0, %c0_i32, %arg1 : i32, i32, i32
  }
  func.func @transform_1(%arg0: i32, %arg1: i32) -> (i32, i32, i32) {
    %c0_i32 = arith.constant 0 : i32
    %c0_i32_0 = arith.constant 0 : i32
    %c0_i32_1 = arith.constant 0 : i32
    return %arg0, %c0_i32, %c0_i32_0 : i32, i32, i32
  }
  func.func @transform_2(%arg0: i32, %arg1: i32) -> (i32, i32, i32) {
    %c0_i32 = arith.constant 0 : i32
    %c0_i32_0 = arith.constant 0 : i32
    %c0_i32_1 = arith.constant 0 : i32
    return %arg0, %c0_i32, %c0_i32_0 : i32, i32, i32
  }
  func.func @transform_3(%arg0: i32, %arg1: i32) -> (i32, i32) {
    %c0_i32 = arith.constant 0 : i32
    %c0_i32_0 = arith.constant 0 : i32
    %c0_i32_1 = arith.constant 0 : i32
    return %c0_i32, %c0_i32_0 : i32, i32
  }
  func.func @transform_4(%arg0: i32, %arg1: i32) -> (i32, i32) {
    %c0_i32 = arith.constant 0 : i32
    %c0_i32_0 = arith.constant 0 : i32
    %c0_i32_1 = arith.constant 0 : i32
    return %c0_i32, %c0_i32_0 : i32, i32
  }
  func.func @transform_5(%arg0: i32, %arg1: i32) -> (i32, i32, i32) {
    %c0_i32 = arith.constant 0 : i32
    %c0_i32_0 = arith.constant 0 : i32
    return %arg0, %c0_i32, %arg1 : i32, i32, i32
  }
  func.func @transform_6(%arg0: i32, %arg1: i32) -> (i32, i32, i32) {
    %c1_i32 = arith.constant 1 : i32
    %0 = arith.muli %arg0, %c1_i32 : i32
    %1 = arith.addi %0, %arg1 : i32
    %c0_i32 = arith.constant 0 : i32
    %c0_i32_0 = arith.constant 0 : i32
    %c0_i32_1 = arith.constant 0 : i32
    return %1, %c0_i32, %c0_i32_0 : i32, i32, i32
  }
}

</mosaic_0001>

<bundles_post_ra>
// kernel: upsampling_layer.3
= control target key start
LH: loop header
LB: loop body
LE: loop exit
PB: predicated region body
PF: predicated region fallthrough
CT: control target
= control target key end

     0   :  { %8 = vsyncpa [#allocation3], 0  ;;  %s710_s0 = inlined_call_operand.hbm [shape: f32[2,8,16], index: 0, kind: input, shape index: {}, may-alias: {0,3}]   ;;  %s711_s1 = inlined_call_operand.vmem [shape: f32[8,1], index: 1, kind: input, shape index: {}]   ;;  %s712_s2 = inlined_call_operand.vmem [shape: f32[8,1], index: 2, kind: input, shape index: {}]   ;;  %s713_s3 = inlined_call_operand.hbm [shape: f32[2,8,16], index: 3, kind: output, shape index: {}, may-alias: {0,3}]  }
   0x1   :  { %10 = vsyncpa [#allocation3 + $0x1], 0 }
   0x2   :  { %11 = vsyncpa [#allocation4], 0 }
   0x3   :  { %13 = vsyncpa [#allocation4 + $0x1], 0  ;;  %s532_s12 = smov 0   ;;  %s534_s13 = smov 0  }
   0x4   :  { %s536_s14 = smov 0   ;;  %s538_s15 = smov 0  }
   0x5   :  { %s540_s16 = smov 0   ;;  %s542_s17 = smov 0  }
   0x6 LB: > { %s318_s18 = sadd.s32 4294967295, %s507_s17   ;;  %s319_s19 = sadd.s32 4294967294, %s507_s17   ;;  %s507_s17 = sphi %s542_s17, %s19_s17   ;;  %s503_s16 = sphi %s540_s16, %s729_s16   ;;  %s499_s15 = sphi %s538_s15, %s728_s15   ;;  %s495_s14 = sphi %s536_s14, %s727_s14   ;;  %s491_s13 = sphi %s534_s13, %s726_s13   ;;  %s487_s12 = sphi %s532_s12, %s725_s12  }
   0x7   : > { %s31_s20 = sadd.s32 1, %s503_s16  ;;  %s40_s21 = sadd.s32 1, %s495_s14 }
   0x8   : > { %p33_p0 = scmp.ge.s32.totalorder %s31_s20, 2  ;;  %p47_p1 = scmp.ne.s32.totalorder %s495_s14, %s491_s13 }
   0x9   : > { %p48_p2 = scmp.eq.s32.totalorder %s507_s17, 0  ;;  %p53_p3 = scmp.ne.s32.totalorder %s491_s13, %s487_s12 }
   0xa   : > { %s731_s20 = smov (%p33_p0, %s31_s20), 0  ;;  %p54_p5 = scmp.eq.s32.totalorder %s318_s18, 0 }
   0xb   : > { %p573_p4 = por %p48_p2, %p47_p1  ;;  %s35_s23 = ssub.s32 %s503_s16, %s731_s20 }
   0xc   : > { %p121_p6 = scmp.eq.s32.totalorder %s318_s18, 1  ;;  %p38_p7 = scmp.eq.s32.totalorder %s35_s23, 0 }
   0xd   : > { %p579_p8 = por %p54_p5, %p53_p3  ;;  %p127_p10 = scmp.eq.s32.totalorder %s319_s19, 1 }
   0xe   : > { %p583_p9 = por %p121_p6, %p47_p1  ;;  %p343_p13 = scmp.lt.s32.totalorder %s507_s17, 2 }
   0xf   : > { %s588_s26 = scalar_select %p38_p7, %s495_s14, %s40_s21  }
  0x10   : > { %s717_s25 = scalar_select %p583_p9, 1, 0 }
  0x11   : > { %p590_p11 = por %p127_p10, %p53_p3  ;;  %s153_s28 = sand.u32 1, %s495_s14  }
  0x12   : > { %s322_s29 = sshll.u32 %s153_s28, 3  ;;  %s323_s30 = sshll.u32 %s503_s16, 7 }
  0x13   : > { %s718_s27 = scalar_select %p590_p11, 1, 0 }
  0x14   : > { %s601_s6 = scalar_lea.hbm %s710_s0, %s323_s30  ;;  %s157_s7 = scalar_lea.vmem [#allocation2], %s322_s29 }
  0x15   : > { %s165_s8 = sshll.u32 %s157_s7, 4  ;;  %p607_p0 = pnand %p343_p13, %p573_p4  ;;  %s603_s8 = int_to_ptr.vmem [resolvable:$true] %s165_s8 }
  0x16   : > { %s154_s10 = scalar_lea.sflag [#allocation3], %s153_s28  ;;  %s395_s11 = scalar_lea.hbm %s601_s6, 128 }
  0x17   : > { %p396_p3 = scmp.ne.s32.totalorder %s601_s6, %s395_s11  ;;  %p397_p5 = pneg %p607_p0 }
  0x18   : > { %s400_s21 = scalar_lea.hbm %s710_s0, 256  ;;  %p401_p4 = scmp.lt.u32.totalorder %s601_s6, %s710_s0 }
  0x19   : > { %p398_p6 = pnand %p397_p5, %p396_p3  ;;  %p402_p10 = scmp.lt.u32.totalorder %s400_s21, %s395_s11 }
  0x1a   : > { %p404_p12 = scmp.lt.u32.totalorder %s395_s11, %s601_s6 }
  0x1b   : > { %p399_p7 = pneg %p398_p6  ;;  %p403_p13 = por %p402_p10, %p401_p4 }
  0x1d   : > { %p405_p1 = por %p404_p12, %p403_p13 }
  0x1f   : > { %p406_p2 = pnand %p405_p1, %p399_p7 }
  0x21   : > { %409 = shalt.err (!%p406_p2)
}
  0x22   : > { %s410_s28 = scalar_lea.vmem %s603_s8, 128  ;;  %s509_s29 = smov [#allocation2]  }
  0x23   : > { %p411_p3 = scmp.ne.s32.totalorder %s603_s8, %s410_s28  ;;  %s415_s30 = sshll.u32 %s509_s29, 4  ;;  %s416_s30 = int_to_ptr.vmem [resolvable:$false] %s415_s30 }
  0x24   : > { %s417_s4 = scalar_lea.vmem %s416_s30, 256  ;;  %p418_p9 = scmp.lt.s32.totalorder %s603_s8, %s416_s30 }
  0x25   : > { %p413_p6 = pnand %p411_p3, %p397_p5  ;;  %p419_p4 = scmp.lt.s32.totalorder %s417_s4, %s410_s28 }
  0x27   : > { %p414_p11 = pneg %p413_p6  ;;  %p420_p10 = por %p419_p4, %p418_p9 }
  0x29   : > { %p421_p12 = pnand %p420_p10, %p414_p11 }
  0x2b   : > { %424 = shalt.err (!%p421_p12)
}
  0x2c   : > { %338 = dma.hbm_to_vmem [thread:$0]  (!%p607_p0), %s601_s6, 128, %s603_s8, %s154_s10  }
  0x2d   : > { %p720_p1 = scmp.lt.s32.totalorder %s507_s17, 3  ;;  %p721_p2 = scmp.ge.s32.totalorder %s507_s17, 1 }
  0x2f   : > { %p171_p5 = pnand %p721_p2, %p720_p1 }
  0x30   : > { %s643_s5 = sand.u32 (!%p171_p5), 1, %s491_s13  }
  0x31   : > { %174 = sbr.rel (%p171_p5) target bundleno = 210 (0xd2), region = 32  ;;  %s325_s7 = sshll.u32 (!%p171_p5), %s643_s5, 3 }
  0x32   : > { %s177_s11 = scalar_lea.sflag (!%p171_p5), [#allocation3], %s643_s5  ;;  %s180_s18 = scalar_lea.vmem (!%p171_p5), [#allocation2], %s325_s7 }
  0x38   : > { %478 = dma.done.wait (%p579_p8), %s177_s11, 128  }
  0x39   : > { %480 = vsyncadd (%p579_p8), %s177_s11, 4294967168  ;;  %v510_v0 = vmov 0   ;;  %v204_v1 = vld [vmem:[%s711_s1] sm:$0xff]  ;;  %s328_s24 = sshll.u32 %s499_s15, 7  ;;  %s202_s19 = scalar_lea.vmem [#allocation5], %s325_s7  ;;  %vm221_vm1 = vcmask 130048  }
  0x3a   : > { %394 = vset.pattern.permute.xlu0 %v510_v0  ;;  %v211_v2 = vld [vmem:[%s712_s2] sm:$0xff]  ;;  %s238_s21 = sshll.u32 %s202_s19, 4  ;;  %s661_s28 = scalar_lea.hbm %s713_s3, %s328_s24  ;;  %s663_s21 = int_to_ptr.vmem [resolvable:$true] %s238_s21 }
  0x3b   : > { %207 = vperm.xlu0 %394, %v204_v1   ;;  %v203_v4 = vld [vmem:[%s180_s18] sm:$0xff]  ;;  %s224_s29 = scalar_lea.sflag [#allocation4], %s643_s5  ;;  %s425_s30 = scalar_lea.vmem %s663_s21, 128 }
  0x3c   : > { %p426_p8 = scmp.ne.s32.totalorder %s663_s21, %s425_s30  ;;  %p722_p9 = scmp.ne.s32.totalorder %s717_s25, 0 }
  0x3d   : > { %s511_s15 = smov [#allocation5]  }
  0x3e   : > { %p427_p11 = pnand %p426_p8, %p722_p9  ;;  %s429_s4 = sshll.u32 %s511_s15, 4  ;;  %s430_s4 = int_to_ptr.vmem [resolvable:$false] %s429_s4 }
  0x3f   : > { %214 = vperm.xlu0 %394, %v211_v2   ;;  %s431_s7 = scalar_lea.vmem %s430_s4, 256  ;;  %p432_p7 = scmp.lt.s32.totalorder %s663_s21, %s430_s4 }
  0x40   : > { %p428_p0 = pneg %p427_p11  ;;  %p433_p13 = scmp.lt.s32.totalorder %s431_s7, %s425_s30 }
  0x42   : > { %p434_p3 = por %p433_p13, %p432_p7 }
  0x44   : > { %p435_p6 = pnand %p434_p3, %p428_p0 }
  0xba   : > { %v208_v3 = vpop.permute.xlu0 %207 }
  0xbb   : > { %v210_v5 = vmul.f32 %v208_v3, %v203_v4 }
  0xbe   : > { %v215_v6 = vpop.permute.xlu0 %214 }
  0xbf   : > { %v217_v7 = vadd.f32 %v215_v6, %v210_v5 }
  0xc1   : > { %vm218_vm0 = vcmp.ge.f32.partialorder %v217_v7, 0.0  ;;  %v219_v8 = vmul.f32 0.1, %v217_v7 }
  0xc3   : > { %v220_v9 = vsel %vm218_vm0, %v217_v7, %v219_v8 }
  0xc4   : > { %222 = vst.msk [vmem:[%s202_s19] sm:$0xff] %vm221_vm1, %v220_v9 }
  0xc5   : > { %438 = shalt.err (!%p435_p6)
}
  0xc6   : > { %s439_s5 = scalar_lea.hbm %s661_s28, 128  ;;  %s443_s6 = scalar_lea.hbm %s713_s3, 256 }
  0xc7   : > { %p440_p4 = scmp.ne.s32.totalorder %s661_s28, %s439_s5  ;;  %p444_p1 = scmp.lt.u32.totalorder %s661_s28, %s713_s3 }
  0xc8   : > { %p445_p2 = scmp.lt.u32.totalorder %s443_s6, %s439_s5  ;;  %p447_p8 = scmp.lt.u32.totalorder %s439_s5, %s661_s28 }
  0xc9   : > { %p441_p10 = pnand %p440_p4, %p722_p9 }
  0xca   : > { %p446_p5 = por %p445_p2, %p444_p1 }
  0xcb   : > { %p442_p12 = pneg %p441_p10 }
  0xcc   : > { %p448_p11 = por %p447_p8, %p446_p5 }
  0xce   : > { %p449_p0 = pnand %p448_p11, %p442_p12 }
  0xd0   : > { %452 = shalt.err (!%p449_p0)
}
  0xd1   : > { %333 = dma.vmem_to_hbm [thread:$0]  (%p722_p9), %s663_s21, 128, %s661_s28, %s224_s29  }
  0xd2 PF: > { %s250_s10 = sand.u32 1, %s487_s12   ;;  %p723_p7 = scmp.ne.s32.totalorder %s718_s27, 0 }
  0xd3   : > { %p724_p13 = scmp.ge.s32.totalorder %s507_s17, 2  ;;  %s251_s24 = scalar_lea.sflag [#allocation4], %s250_s10 }
  0xd5   : > { %p340_p3 = pnand %p724_p13, %p723_p7 }
  0xd7   : > { %482 = dma.done.wait (!%p340_p3), %s251_s24, 128  }
  0xd8   : > { %484 = vsyncadd (!%p340_p3), %s251_s24, 4294967168  ;;  %s19_s17 = sadd.s32 1, %s507_s17   ;;  %s725_s12 = smov %s491_s13 }
  0xd9   : > { %p16_p6 = scmp.ge.s32.totalorder %s19_s17, 4   ;;  %s726_s13 = smov %s495_s14 }
  0xda   : > { %s727_s14 = smov %s588_s26  ;;  %s728_s15 = smov %s503_s16 }
  0xdb   : > { %s729_s16 = smov %s731_s20  ;;  %18 = sbr.rel (!%p16_p6) target bundleno = 6 (0x6), region = 77 }
  0xe2   :  { %256 = vsyncpa [#allocation3], 1 }
  0xe3   :  { %258 = vsyncpa [#allocation3 + $0x1], 1 }
  0xe4   :  { %259 = vsyncpa [#allocation4], 1 }
  0xe5   :  { %261 = vsyncpa [#allocation4 + $0x1], 1 }

// kernel: upsampling_layer.2
= control target key start
LH: loop header
LB: loop body
LE: loop exit
PB: predicated region body
PF: predicated region fallthrough
CT: control target
= control target key end

     0   :  { %12 = vsyncpa [#allocation3], 0  ;;  %s926_s0 = inlined_call_operand.vmem [shape: f32[2,4,16], index: 0, kind: input, shape index: {}, may-alias: {0,1,2}]   ;;  %s927_s1 = inlined_call_operand.vmem [shape: f32[2,4,16], index: 1, kind: input, shape index: {}, may-alias: {0,1,2}]   ;;  %s928_s2 = inlined_call_operand.vmem [shape: f32[2,4,16], index: 2, kind: input, shape index: {}, may-alias: {0,1,2}]   ;;  %s929_s3 = inlined_call_operand.vmem [shape: bf16[8,20], index: 3, kind: input, shape index: {}]   ;;  %s930_s4 = inlined_call_operand.vmem [shape: f32[8,1], index: 4, kind: input, shape index: {}]   ;;  %s931_s5 = inlined_call_operand.hbm [shape: f32[2,8,16], index: 5, kind: output, shape index: {0}]   ;;  %s932_s6 = inlined_call_operand.vmem [shape: f32[2,8,2], index: 6, kind: output, shape index: {1}]  }
   0x1   :  { %14 = vsyncpa [#allocation3 + $0x1], 0  ;;  %s807_s21 = smov 0   ;;  %s809_s1 = smov 0  }
   0x2   :  { %s811_s22 = smov 0   ;;  %s813_s2 = smov 0  }
   0x3   :  { %s815_s23 = smov 0   ;;  %s817_s24 = smov 0  }
   0x4 LB: > { %s588_s25 = sadd.s32 4294967295, %s759_s24   ;;  %s589_s26 = sadd.s32 4294967294, %s759_s24   ;;  %s759_s24 = sphi %s817_s24, %s20_s24   ;;  %s755_s23 = sphi %s815_s23, %s939_s23   ;;  %s751_s2 = sphi %s813_s2, %s938_s2   ;;  %s747_s22 = sphi %s811_s22, %s937_s22   ;;  %s743_s1 = sphi %s809_s1, %s936_s1   ;;  %s739_s21 = sphi %s807_s21, %s935_s21  }
   0x5   : > { %s32_s27 = sadd.s32 1, %s755_s23  ;;  %s163_s28 = sadd.s32 1, %s747_s22 }
   0x6   : > { %p34_p0 = scmp.ge.s32.totalorder %s32_s27, 2  ;;  %p173_p1 = scmp.ne.s32.totalorder %s747_s22, %s743_s1 }
   0x7   : > { %p174_p2 = scmp.eq.s32.totalorder %s588_s25, 1  ;;  %p179_p3 = scmp.ne.s32.totalorder %s743_s1, %s739_s21 }
   0x8   : > { %s941_s27 = smov (%p34_p0, %s32_s27), 0  ;;  %p180_p5 = scmp.eq.s32.totalorder %s589_s26, 1 }
   0x9   : > { %p847_p4 = por %p174_p2, %p173_p1  ;;  %s158_s30 = ssub.s32 %s755_s23, %s941_s27 }
   0xa   : > { %p592_p6 = scmp.ge.s32.totalorder %s759_s24, 1  ;;  %p161_p7 = scmp.eq.s32.totalorder %s158_s30, 0 }
   0xb   : > { %p854_p8 = por %p180_p5, %p179_p3  ;;  %p256_p9 = scmp.lt.s32.totalorder %s759_s24, 3 }
   0xc   : > { %s860_s8 = scalar_select %p161_p7, %s747_s22, %s163_s28  }
   0xd   : > { %p257_p10 = pnand %p592_p6, %p256_p9 }
   0xe   : > { %p301_p11 = scmp.lt.s32.totalorder (!%p257_p10), %s751_s2, 1  ;;  %v761_v0 = vmov (!%p257_p10), 0   ;;  %s762_s9 = smov (!%p257_p10), 114   ;;  %v765_v4 = vmov (!%p257_p10), 0.0   ;;  %vm348_vm0 = vcmask (!%p257_p10), 15360   ;;  %vm352_vm1 = vcmask (!%p257_p10), 146432  }
   0xf   : > { %260 = sbr.rel (%p257_p10) target bundleno = 635 (0x27b), region = 40  ;;  %340 = vrot.lane.b32.xlu0 (!%p257_p10), %v761_v0, %s762_s9  ;;  %679 = vset.pattern.permute.xlu1 (!%p257_p10), %v761_v0  ;;  %s763_s11 = smov (!%p257_p10), 18   ;;  %vm766_vm2 = vmmov (!%p257_p10), 0   ;;  %v378_v12 = vld [vmem:[%s930_s4] sm:$0xff] (!%p257_p10)  ;;  %vm367_vm3 = vcmask (!%p257_p10), 1041408   ;;  %vm370_vm4 = vcmask (!%p257_p10), 1043456  }
  0x10   : > { %346 = vrot.lane.b32.xlu1 (!%p257_p10), %v761_v0, %s763_s11  ;;  %680 = vset.pattern.permute.xlu0 (!%p257_p10), %v761_v0  ;;  %s764_s16 = smov (!%p257_p10), 2   ;;  %s767_s17 = smov (!%p257_p10), 126   ;;  %vm373_vm5 = vcmask (!%p257_p10), 1045504   ;;  %v377_v21 = vld [vmem:[%s929_s3] sm:$0xf] (!%p257_p10)  ;;  %vm384_vm6 = vcmask (!%p257_p10), 162816  }
  0x11   : > { %606 = vmatprep.subr.bf16.mxu0 (!%p257_p10), %v765_v4  ;;  %610 = vmatprep.mubr.msk.bf16.mxu0 (!%p257_p10), %vm766_vm2, %v765_v4  ;;  %s768_s18 = smov (!%p257_p10), 127   ;;  %s769_s19 = smov (!%p257_p10), 124   ;;  %vm431_vm7 = vcmask (!%p257_p10), 130048  }
  0x12   : > { %s770_s20 = smov (!%p257_p10), 125   ;;  %s291_s9 = sand.u32 (!%p257_p10), 1, %s743_s1  }
  0x13   : > { %s593_s11 = sshll.u32 (!%p257_p10), %s291_s9, 3  ;;  %s600_s13 = sshll.u32 (!%p257_p10), %s751_s2, 7 }
  0x16   : > { %s864_s10 = scalar_select %p301_p11, %s751_s2, 1 }
  0x18   : > { %s594_s12 = sshll.u32 %s864_s10, 2 }
  0x19   : > { %s307_s15 = scalar_lea.vmem %s926_s0, %s594_s12  ;;  %s293_s12 = scalar_lea.vmem [#allocation2], %s593_s11 }
  0x1a   : > { %v323_v1 = vld [vmem:[%s307_s15] sm:$0xf]  ;;  %s464_s14 = sshll.u32 %s293_s12, 4  ;;  %s465_s14 = int_to_ptr.vmem [resolvable:$true] %s464_s14 }
  0x1b   : > { %v324_v2 = vpack.c.bf16 %v323_v1, %v323_v1 }
  0x1d   : > { %343 = vrot.lane.b32.xlu0 %v324_v2, %s764_s16 }
  0x81   : > { %v341_v3 = vpop.permute.xlu0 %340 }
  0x82   : > { %v347_v5 = vpop.permute.xlu1 %346 }
  0x8f   : > { %v344_v6 = vpop.permute.xlu0 %343 }
  0x90   : > { %v351_v7 = vsel %vm348_vm0, %v341_v3, %v344_v6 }
  0x91   : > { %v354_v8 = vsel %vm352_vm1, %v351_v7, %v347_v5 }
  0x92   : > { %v359_v9 = vrot.slane %v354_v8, 4  ;;  %v356_v10 = vrot.slane %v354_v8, 6  ;;  %v362_v11 = vrot.slane %v354_v8, 2 }
  0x94   : > { %360 = vrot.lane.b32.xlu0 %v359_v9, %s767_s17  ;;  %357 = vrot.lane.b32.xlu1 %v356_v10, %s768_s18  ;;  %s881_s17 = scalar_lea.hbm %s931_s5, %s600_s13  ;;  %s445_s18 = scalar_lea.sflag [#allocation3], %s291_s9 }
  0x98   : > { %365 = vrot.lane.b32.xlu0 %v354_v8, %s769_s19  ;;  %363 = vrot.lane.b32.xlu1 %v362_v11, %s770_s20  ;;  %s681_s19 = scalar_lea.vmem %s465_s14, 128  ;;  %s771_s20 = smov [#allocation2]  }
  0x99   : > { %p682_p12 = scmp.ne.s32.totalorder %s465_s14, %s681_s19  ;;  %s685_s25 = sshll.u32 %s771_s20, 4  ;;  %s686_s25 = int_to_ptr.vmem [resolvable:$false] %s685_s25 }
  0x9a   : > { %s687_s26 = scalar_lea.vmem %s686_s25, 256  ;;  %p688_p1 = scmp.lt.s32.totalorder %s465_s14, %s686_s25 }
  0x9b   : > { %p683_p13 = pnand %p682_p12, %p847_p4  ;;  %p689_p2 = scmp.lt.s32.totalorder %s687_s26, %s681_s19 }
  0x9c   : > { %381 = vperm.xlu1 %679, %v378_v12  }
  0x9d   : > { %p684_p0 = pneg %p683_p13  ;;  %p690_p3 = por %p689_p2, %p688_p1 }
  0x9f   : > { %p691_p5 = pnand %p690_p3, %p684_p0 }
 0x106   : > { %v361_v13 = vpop.permute.xlu0 %360  ;;  %v358_v14 = vpop.permute.xlu1 %357 }
 0x107   : > { %v369_v15 = vsel %vm367_vm3, %v354_v8, %v358_v14 }
 0x108   : > { %v372_v17 = vsel %vm370_vm4, %v369_v15, %v361_v13 }
 0x10a   : > { %v364_v16 = vpop.permute.xlu1 %363  ;;  %v366_v19 = vpop.permute.xlu0 %365 }
 0x10b   : > { %v375_v18 = vsel %vm373_vm5, %v372_v17, %v364_v16  ;;  %v389_v20 = vsel %vm367_vm3, %v366_v19, 0 }
 0x10c   : > { %607 = vmatpush3.bf16.msra.mxu0 %v375_v18 }
 0x10d   : > { %608 = vmatprep.subr.bf16.mxu0 %v765_v4 }
 0x110   : > { %609 = vmatpush3.bf16.msra.mxu0 %v389_v20 }
 0x113   : > { %611 = vmatmul.mubr.msk.bf16.vlgmr.msra.gmra.mrb[0].mxu0 %vm384_vm6, %v377_v21 }
 0x11b   : > { %v382_v22 = vpop.permute.xlu1 %381 }
 0x1e6   : > { %v425_v23 = vpop.f32.mrb[0].mxu0 }
 0x1e7   : > { %v426_v24 = vadd.f32 %v425_v23, %v382_v22  ;;  %v612_v25 = vpop.f32.mrb[1].mxu0 }
 0x1e8   : > { %v428_v26 = vpop.f32.mrb[2].mxu0 }
 0x1e9   : > { %v613_v27 = vpop.f32.mrb[3].mxu0  ;;  %v433_v28 = vsel %vm431_vm7, %v426_v24, 0.0  ;;  %v438_v29 = vmul.f32 %v426_v24, %v426_v24  ;;  %432 = vst.msk [vmem:[%s293_s12] sm:$0xff] %vm431_vm7, %v426_v24 }
 0x1ea   : > { %434 = vadd.xlane.f32.xlu0 %v433_v28 }
 0x1eb   : > { %v439_v30 = vsel %vm431_vm7, %v438_v29, 0.0 }
 0x1ec   : > { %440 = vadd.xlane.f32.xlu1 %v439_v30 }
 0x1ed   : > { %694 = shalt.err (!%p691_p5)
}
 0x1ee   : > { %s695_s2 = scalar_lea.hbm %s881_s17, 128  ;;  %s699_s9 = scalar_lea.hbm %s931_s5, 256 }
 0x1ef   : > { %p696_p6 = scmp.ne.s32.totalorder %s881_s17, %s695_s2  ;;  %p700_p10 = scmp.lt.u32.totalorder %s881_s17, %s931_s5 }
 0x1f0   : > { %p701_p11 = scmp.lt.u32.totalorder %s699_s9, %s695_s2  ;;  %p703_p13 = scmp.lt.u32.totalorder %s695_s2, %s881_s17 }
 0x1f1   : > { %p697_p7 = pnand %p696_p6, %p847_p4 }
 0x1f2   : > { %p702_p12 = por %p701_p11, %p700_p10 }
 0x1f3   : > { %p698_p9 = pneg %p697_p7 }
 0x1f4   : > { %p704_p0 = por %p703_p13, %p702_p12 }
 0x1f6   : > { %p705_p1 = pnand %p704_p0, %p698_p9 }
 0x1f8   : > { %708 = shalt.err (!%p705_p1)
}
 0x1f9   : > { %614 = dma.vmem_to_hbm [thread:$0]  (%p847_p4), %s465_s14, 128, %s881_s17, %s445_s18   ;;  %vm436_vm8 = vcmask 7168   ;;  %vm442_vm9 = vcmask 15368  }
 0x1fa   : > { %s597_s13 = sshll.u32 %s864_s10, 3 }
 0x1fb   : > { %s320_s19 = scalar_lea.vmem %s932_s6, %s597_s13 }
 0x277   : > { %v435_v31 = vpop.xlane.xlu0 %434 }
 0x278   : > { %437 = vst.msk [vmem:[%s320_s19] sm:$0xff] %vm436_vm8, %v435_v31 }
 0x279   : > { %v441_v32 = vpop.xlane.xlu1 %440 }
 0x27a   : > { %443 = vst.msk [vmem:[%s320_s19] sm:$0xff] %vm442_vm9, %v441_v32 }
 0x27b PF: > { %p620_p2 = scmp.ge.s32.totalorder %s759_s24, 2  ;;  %s480_s29 = sand.u32 1, %s739_s21  }
 0x27c   : > { %s481_s14 = scalar_lea.sflag [#allocation3], %s480_s29 }
 0x27d   : > { %p617_p3 = pnand %p620_p2, %p854_p8 }
 0x27f   : > { %734 = dma.done.wait (!%p617_p3), %s481_s14, 128  }
 0x280   : > { %736 = vsyncadd (!%p617_p3), %s481_s14, 4294967168  ;;  %s20_s24 = sadd.s32 1, %s759_s24   ;;  %s935_s21 = smov %s743_s1 }
 0x281   : > { %p17_p4 = scmp.ge.s32.totalorder %s20_s24, 4   ;;  %s936_s1 = smov %s747_s22 }
 0x282   : > { %s937_s22 = smov %s860_s8  ;;  %s938_s2 = smov %s755_s23 }
 0x283   : > { %s939_s23 = smov %s941_s27  ;;  %19 = sbr.rel (!%p17_p4) target bundleno = 4 (0x4), region = 93 }
 0x28a   :  { %494 = vsyncpa [#allocation3], 1 }
 0x28b   :  { %496 = vsyncpa [#allocation3 + $0x1], 1 }

</bundles_post_ra>
